<compile_context>
chip_gen: v7x
topology: tpu7x:2x2x1
jax: 0.10.0
libtpu: 0.0.40
codegen_flags: <defaults>
</compile_context>

<pallas_src>
import math

import jax
import jax.numpy as jnp
from jax.experimental import pallas as pl
from jax.experimental.pallas import tpu as pltpu

CFG = {"variance": [0.1, 0.2]}
_V0 = float(CFG["variance"][0])
_V1 = float(CFG["variance"][1])
_EPS = 1e-9
_LANES = 128
_MAX_TILE_G = 128            # <= 16384 priors / grid step (~3 MB VMEM per step)


# ----------------------------------------------------------------------------
# in-kernel helpers
# ----------------------------------------------------------------------------
def _atan_poly(x):
    # Minimax polynomial arctan (|err| ~1e-6); EUP approx reciprocal for 1/|x|.
    ax = jnp.abs(x)
    inv = ax > 1.0
    t = jnp.where(inv, pl.reciprocal(jnp.maximum(ax, 1e-20), approx=True), ax)
    t2 = t * t
    p = t * (0.99997726 + t2 * (-0.33262347 + t2 * (0.19354346 +
            t2 * (-0.11643287 + t2 * (0.05265332 + t2 * (-0.01172120))))))
    r = jnp.where(inv, (math.pi * 0.5) - p, p)
    return jnp.where(x < 0, -r, r)


# ----------------------------------------------------------------------------
# Kernel: smooth-L1 (loc + four corners), decode + CIoU border loss,
#         per-prior confidence CE (unmasked) — all on (tile_g, 128) tiles.
# ----------------------------------------------------------------------------
def _ssd_loss_kernel(loc_ref, fcp_ref, fct_ref, ca_ref, pr_ref, out_ref):
    f32 = jnp.float32
    n_cls = ca_ref.shape[0] - 1
    tgt = ca_ref[n_cls]                              # (tg, 128) class id (f32)
    pos = (tgt > 0.0).astype(f32)                    # positive mask

    # --- smooth-L1 on loc, per prior (sum over 4 coords), masked ---
    lp = loc_ref[0:4]                                # (4, tg, 128) predictions
    lt = loc_ref[4:8]                                # (4, tg, 128) targets
    d = lp - lt
    ad = jnp.abs(d)
    sl = jnp.where(ad < 1.0, 0.5 * d * d, ad - 0.5)
    out_ref[0] = jnp.sum(sl, axis=0) * pos

    # --- smooth-L1 on four corners, per prior (8 coords), masked ---
    d8 = fcp_ref[...] - fct_ref[...]
    ad8 = jnp.abs(d8)
    sl8 = jnp.where(ad8 < 1.0, 0.5 * d8 * d8, ad8 - 0.5)
    out_ref[1] = jnp.sum(sl8, axis=0) * pos

    # --- decode loc preds (SSD center-offset decode), (2, tg, 128) vectorized ---
    pxy = pr_ref[0:2]                                # (2, tg, 128): cx, cy
    pwh = pr_ref[2:4]                                # (2, tg, 128): w, h
    cxy = pxy + lp[0:2] * (_V0 * pwh)
    wh2 = pwh * jnp.exp(lp[2:4] * _V1)
    b2min = cxy - 0.5 * wh2
    b2max = b2min + wh2
    b2x1, b2y1 = b2min[0], b2min[1]
    b2x2, b2y2 = b2max[0], b2max[1]
    w2, h2 = wh2[0], wh2[1]

    # --- decode four-corner preds (TextBoxes++): rows are [x1..x4, y1..y4] ---
    xs = pxy[0][None] + fcp_ref[0:4] * (_V0 * pwh[0])[None]   # (4, tg, 128)
    ys = pxy[1][None] + fcp_ref[4:8] * (_V0 * pwh[1])[None]   # (4, tg, 128)
    b1x1 = jnp.minimum(xs[0], xs[3])      # left   = min(x of pt0, pt3)
    b1y1 = jnp.minimum(ys[0], ys[1])      # top    = min(y of pt0, pt1)
    b1x2 = jnp.maximum(xs[1], xs[2])      # right  = max(x of pt1, pt2)
    b1y2 = jnp.maximum(ys[2], ys[3])      # bottom = max(y of pt2, pt3)

    # --- CIoU between the quad-derived box (b1) and the decoded loc box (b2) ---
    w1 = b1x2 - b1x1
    h1 = b1y2 - b1y1
    area1 = w1 * h1
    area2 = w2 * h2
    c1x = 0.5 * (b1x1 + b1x2)
    c1y = 0.5 * (b1y1 + b1y2)
    c2x, c2y = cxy[0], cxy[1]
    iw = jnp.maximum(jnp.minimum(b1x2, b2x2) - jnp.maximum(b1x1, b2x1), 0.0)
    ih = jnp.maximum(jnp.minimum(b1y2, b2y2) - jnp.maximum(b1y1, b2y1), 0.0)
    inter = iw * ih
    ow = jnp.maximum(jnp.maximum(b1x2, b2x2) - jnp.minimum(b1x1, b2x1), 0.0)
    oh = jnp.maximum(jnp.maximum(b1y2, b2y2) - jnp.minimum(b1y1, b2y1), 0.0)
    outer_diag = ow * ow + oh * oh
    inter_diag = (c2x - c1x) * (c2x - c1x) + (c2y - c1y) * (c2y - c1y)
    union = area1 + area2 - inter
    # Exact divides for iou / u (parity with torch); approx recips elsewhere.
    iou = inter / jnp.maximum(union, _EPS)
    u = inter_diag / jnp.maximum(outer_diag, _EPS)

    # Aspect-ratio term.  Sign-preserving handling of degenerate (h1<0) quads;
    # atan(r2)-atan(r1) computed with the single-arctan identity (one poly).
    inv_h1 = pl.reciprocal(jnp.maximum(jnp.abs(h1), _EPS), approx=True)
    r1 = jnp.where(h1 < 0.0, -w1 * inv_h1, w1 * inv_h1)
    r2 = w2 * pl.reciprocal(jnp.maximum(h2, _EPS), approx=True)
    num = r2 - r1
    den = 1.0 + r1 * r2
    inv_den = pl.reciprocal(jnp.maximum(jnp.abs(den), _EPS), approx=True)
    t = jnp.where(den < 0.0, -num * inv_den, num * inv_den)
    diff = _atan_poly(t) + jnp.where(
        den < 0.0, jnp.where(num >= 0.0, math.pi, -math.pi), 0.0)
    v = (4.0 / (math.pi * math.pi)) * diff * diff
    alpha = v * pl.reciprocal((1.0 - iou) + v + _EPS, approx=True)
    ciou = jnp.clip(iou - (u + alpha * v), -1.0, 1.0)
    out_ref[2] = jnp.where(tgt > 0.0, 1.0 - ciou, 0.0)

    # --- per-prior conf CE: log_sum_exp(conf) - conf[target]  (UNMASKED) ---
    conf = ca_ref[0:n_cls]                           # (C, tg, 128)
    m = jnp.max(conf, axis=0)
    lse = jnp.log(jnp.sum(jnp.exp(conf - m[None]), axis=0)) + m
    gathered = jnp.zeros_like(m)
    for c in range(n_cls):                           # unrolled class gather
        gathered = gathered + jnp.where(tgt == float(c), conf[c], 0.0)
    out_ref[3] = lse - gathered


def _choose_tiling(P, B):
    G = -(-P // _LANES)                          # 128-lane prior groups
    n_tiles = max(1, -(-G // _MAX_TILE_G))
    if B * n_tiles < 2 and G > 8:
        n_tiles = 2                              # keep >=2 steps for v7x's 2 TCs
    per_tile = -(-G // n_tiles)
    tile_g = max(8, -(-per_tile // 8) * 8)       # full (8,128) sublane tiles
    return tile_g, tile_g * n_tiles


def _run_loss_kernel(loc8, fc_p, fc_t, conf_aux, priors_g, tile_g):
    B, _, G_pad, L = loc8.shape
    rows_ca = conf_aux.shape[1]
    n_cls = rows_ca - 1
    n_tiles = G_pad // tile_g
    grid = (n_tiles, B)                          # batch innermost: priors reused
    npr = B * G_pad * L
    cost = pl.CostEstimate(
        flops=int(npr * (230 + 10 * n_cls)),
        transcendentals=int(npr * (n_cls + 10)),
        bytes_accessed=int(4 * (npr * (29 + rows_ca) + 4 * G_pad * L)),
    )
    return pl.pallas_call(
        _ssd_loss_kernel,
        out_shape=jax.ShapeDtypeStruct((B, 4, G_pad, L), jnp.float32),
        grid=grid,
        in_specs=[
            pl.BlockSpec((None, 8, tile_g, L), lambda j, b: (b, 0, j, 0)),
            pl.BlockSpec((None, 8, tile_g, L), lambda j, b: (b, 0, j, 0)),
            pl.BlockSpec((None, 8, tile_g, L), lambda j, b: (b, 0, j, 0)),
            pl.BlockSpec((None, rows_ca, tile_g, L), lambda j, b: (b, 0, j, 0)),
            # priors: block index constant across the inner batch loop -> one DMA
            pl.BlockSpec((4, tile_g, L), lambda j, b: (0, j, 0)),
        ],
        out_specs=pl.BlockSpec((None, 4, tile_g, L), lambda j, b: (b, 0, j, 0)),
        compiler_params=pltpu.CompilerParams(
            dimension_semantics=("parallel", "parallel")),
        cost_estimate=cost,
    )(loc8, fc_p, fc_t, conf_aux, priors_g)


# ----------------------------------------------------------------------------
# Plain-JAX glue: SSD box utilities + matching (data-dependent gather/argmax)
# ----------------------------------------------------------------------------
def point_form(boxes):
    return jnp.concatenate([boxes[:, :2] - boxes[:, 2:] / 2,
                            boxes[:, :2] + boxes[:, 2:] / 2], axis=1)


def jaccard(box_a, box_b):
    max_xy = jnp.minimum(box_a[:, None, 2:], box_b[None, :, 2:])
    min_xy = jnp.maximum(box_a[:, None, :2], box_b[None, :, :2])
    inter = jnp.clip(max_xy - min_xy, 0.0, None)
    inter_area = inter[..., 0] * inter[..., 1]
    area_a = ((box_a[:, 2] - box_a[:, 0]) * (box_a[:, 3] - box_a[:, 1]))[:, None]
    area_b = ((box_b[:, 2] - box_b[:, 0]) * (box_b[:, 3] - box_b[:, 1]))[None, :]
    return inter_area / (area_a + area_b - inter_area)


def encode(matched, priors, variances):
    g_cxcy = (matched[:, :2] + matched[:, 2:]) / 2 - priors[:, :2]
    g_cxcy = g_cxcy / (variances[0] * priors[:, 2:])
    g_wh = (matched[:, 2:] - matched[:, :2]) / priors[:, 2:]
    g_wh = jnp.log(g_wh) / variances[1]
    return jnp.concatenate([g_cxcy, g_wh], axis=1)


def encode_four_corners(matched_fc, priors, variances):
    pts = matched_fc.reshape(-1, 4, 2)
    g = (pts - priors[:, None, :2]) / (variances[0] * priors[:, None, 2:])
    return g.reshape(-1, 8)


def match_four_corners_jax(threshold, truths, fc_truths, labels, priors_c, variances):
    # TODO(synk): variable num_objs / per-image loop is flattened to a fixed T here.
    priors_pt = point_form(priors_c)
    overlaps = jaccard(truths, priors_pt)                       # (T, P)
    best_prior_idx = jnp.argmax(overlaps, axis=1)               # (T,)
    best_truth_overlap = jnp.max(overlaps, axis=0)              # (P,)
    best_truth_idx = jnp.argmax(overlaps, axis=0)               # (P,)
    best_truth_overlap = best_truth_overlap.at[best_prior_idx].set(2.0)
    best_truth_idx = best_truth_idx.at[best_prior_idx].set(
        jnp.arange(truths.shape[0]))
    matches = truths[best_truth_idx]
    matches_fc = fc_truths[best_truth_idx]
    conf = labels[best_truth_idx].astype(jnp.int32) + 1
    conf = jnp.where(best_truth_overlap < threshold, 0, conf)
    loc = encode(matches, priors_c, variances)
    fc = encode_four_corners(matches_fc, priors_c, variances)
    return loc, conf, fc


# ----------------------------------------------------------------------------
# The module
# ----------------------------------------------------------------------------
class MultiBoxLossFourCornersCIoU:
    def __init__(self, num_classes, overlap_thresh, prior_for_matching,
                 bkg_label, neg_mining, neg_pos, neg_overlap, encode_target,
                 use_gpu=True):
        self.num_classes = num_classes
        self.threshold = overlap_thresh
        self.background_label = bkg_label
        self.negpos_ratio = neg_pos
        self.neg_overlap = neg_overlap
        self.variance = CFG["variance"]

    def __call__(self, predictions, targets):
        loc_data, conf_data, priors, four_corners_data = predictions
        f32 = jnp.float32
        B, P, _ = loc_data.shape
        priors = priors[:P, :]

        # --- matching (plain JAX glue) ---
        def match_one(t):
            truths = t[:, :4]
            fc_truths = t[:, 4:12]
            labels = t[:, 12]
            return match_four_corners_jax(self.threshold, truths, fc_truths,
                                          labels, priors, self.variance)

        loc_t, conf_t, fc_t = jax.vmap(match_one)(targets)   # (B,P,4),(B,P),(B,P,8)
        pos = conf_t > 0

        # --- pack kernel inputs: (B, rows, G, 128) lane-dense layout ---
        tile_g, G_pad = _choose_tiling(P, B)
        P_pad = G_pad * _LANES
        pad = P_pad - P

        def pack(x):                      # (B, P, R) -> (B, R, G_pad, 128)
            x = x.astype(f32)
            if pad:
                x = jnp.pad(x, ((0, 0), (0, pad), (0, 0)))
            x = jnp.transpose(x, (0, 2, 1))
            return x.reshape(B, x.shape[1], G_pad, _LANES)

        # de-interleave quad coords to [x1..x4, y1..y4] (order-invariant for L1)
        def xy_split(q):
            return jnp.concatenate([q[..., 0::2], q[..., 1::2]], axis=-1)

        # TODO(synk): inputs could be fed as bf16 (cast upstream, upcast in-kernel)
        # to halve kernel HBM traffic; kept f32 for parity with the torch reference.
        loc8 = pack(jnp.concatenate([loc_data, loc_t], axis=-1))         # (B,8,G,128)
        fc_p = pack(xy_split(four_corners_data))                         # (B,8,G,128)
        fc_tt = pack(xy_split(fc_t))                                     # (B,8,G,128)
        conf_aux = pack(jnp.concatenate(
            [conf_data, conf_t[..., None].astype(f32)], axis=-1))        # (B,C+1,G,128)

        priors_t = priors.T.astype(f32)                                  # (4, P)
        if pad:
            priors_t = jnp.pad(priors_t, ((0, 0), (0, pad)), constant_values=1.0)
        priors_g = priors_t.reshape(4, G_pad, _LANES)

        per_prior = _run_loss_kernel(loc8, fc_p, fc_tt, conf_aux, priors_g, tile_g)
        pp = per_prior.reshape(B, 4, P_pad)

        loss_l_sum = jnp.sum(pp[:, 0])          # padded lanes are exactly zero
        loss_fc_sum = jnp.sum(pp[:, 1])
        loss_b_sum = jnp.sum(pp[:, 2])
        ce = pp[:, 3, :P]                       # unmasked per-prior CE (B,P)

        # --- hard negative mining (single argsort + scatter == double argsort) ---
        loss_c_mine = jnp.where(pos, 0.0, ce)
        loss_idx = jnp.argsort(-loss_c_mine, axis=1)   # descending order indices
        ranks = jnp.broadcast_to(jnp.arange(P, dtype=jnp.int32), (B, P))
        idx_rank = jnp.zeros((B, P), jnp.int32).at[
            jnp.arange(B)[:, None], loss_idx].set(ranks)
        num_pos = jnp.sum(pos.astype(jnp.int32), axis=1, keepdims=True)
        num_neg = jnp.minimum(self.negpos_ratio * num_pos, P - 1)
        neg = idx_rank < num_neg
        sel = jnp.logical_or(pos, neg).astype(f32)
        loss_c_sum = jnp.sum(ce * sel)

        # TODO(synk): torch returns .double(); TPU has no f64 hardware, keep f32.
        Nn = jnp.maximum(jnp.sum(num_pos).astype(f32), 1.0)  # guard zero-positive
        loss_l = loss_l_sum / Nn
        loss_c = loss_c_sum / Nn
        loss_fc = loss_fc_sum / Nn
        loss_border = 16.0 * loss_b_sum / Nn
        return loss_l, loss_c, loss_fc, loss_border


# ----------------------------------------------------------------------------
# main
# ----------------------------------------------------------------------------
if __name__ == "__main__":
    key = jax.random.PRNGKey(0)
    k = jax.random.split(key, 16)
    B, P, C, T = 2, 128, 4, 3          # batch, num_priors, num_classes, num_objs

    # priors (center form)
    pcx = jax.random.uniform(k[0], (P,), jnp.float32, 0.05, 0.95)
    pcy = jax.random.uniform(k[1], (P,), jnp.float32, 0.05, 0.95)
    pw = jax.random.uniform(k[2], (P,), jnp.float32, 0.10, 0.35)
    ph = jax.random.uniform(k[3], (P,), jnp.float32, 0.10, 0.35)
    priors = jnp.stack([pcx, pcy, pw, ph], axis=1)

    # network predictions
    loc_data = 0.2 * jax.random.normal(k[4], (B, P, 4), jnp.float32)
    conf_data = jax.random.normal(k[5], (B, P, C), jnp.float32)
    four_corners_data = 0.2 * jax.random.normal(k[6], (B, P, 8), jnp.float32)

    # ground truth: (B, T, 13) = bbox(4) + quad corners(8) + label(1)
    gcx = jax.random.uniform(k[7], (B, T), jnp.float32, 0.25, 0.75)
    gcy = jax.random.uniform(k[8], (B, T), jnp.float32, 0.25, 0.75)
    gw = jax.random.uniform(k[9], (B, T), jnp.float32, 0.15, 0.40)
    gh = jax.random.uniform(k[10], (B, T), jnp.float32, 0.15, 0.40)
    x1, y1 = gcx - gw / 2, gcy - gh / 2
    x2, y2 = gcx + gw / 2, gcy + gh / 2
    bbox = jnp.stack([x1, y1, x2, y2], axis=-1)
    corners = jnp.stack([x1, y1, x2, y1, x2, y2, x1, y2], axis=-1)
    corners = corners + 0.01 * jax.random.normal(k[11], (B, T, 8), jnp.float32)
    labels = jax.random.randint(k[12], (B, T), 0, C - 1).astype(jnp.float32)
    targets = jnp.concatenate([bbox, corners, labels[..., None]], axis=-1)

    criterion = MultiBoxLossFourCornersCIoU(
        num_classes=C, overlap_thresh=0.5, prior_for_matching=True,
        bkg_label=0, neg_mining=True, neg_pos=3, neg_overlap=0.5,
        encode_target=False)

    # jit so the packing pad+transpose+reshape fuse into a single XLA pass.
    loss_fn = jax.jit(lambda preds, tgts: criterion(preds, tgts))
    losses = loss_fn((loc_data, conf_data, priors, four_corners_data), targets)
    losses = jax.block_until_ready(losses)
    assert all(bool(jnp.isfinite(v)) for v in losses)
    print("KERNEL_OK")
</pallas_src>

<mosaic_0001>
module attributes {stable_mosaic.version = 11 : i64} {
  func.func @_ssd_loss_kernel(%arg0: i32, %arg1: i32, %arg2: memref<1x8x8x128xf32, #tpu.memory_space<vmem>>, %arg3: memref<1x8x8x128xf32, #tpu.memory_space<vmem>>, %arg4: memref<1x8x8x128xf32, #tpu.memory_space<vmem>>, %arg5: memref<1x5x8x128xf32, #tpu.memory_space<vmem>>, %arg6: memref<4x8x128xf32, #tpu.memory_space<vmem>>, %arg7: memref<1x4x8x128xf32, #tpu.memory_space<vmem>>) attributes {dimension_semantics = [#tpu.dimension_semantics<parallel>, #tpu.dimension_semantics<parallel>], iteration_bounds = array<i64: 1, 2>, scalar_prefetch = 0 : i64, scratch_operands = 0 : i64, tpu.core_type = #tpu.core_type<tc>, window_params = [{transform_indices = @transform_0, window_bounds = array<i64: 1, 8, 8, 128>}, {transform_indices = @transform_1, window_bounds = array<i64: 1, 8, 8, 128>}, {transform_indices = @transform_2, window_bounds = array<i64: 1, 8, 8, 128>}, {transform_indices = @transform_3, window_bounds = array<i64: 1, 5, 8, 128>}, {transform_indices = @transform_4, window_bounds = array<i64: 4, 8, 128>}, {transform_indices = @transform_5, window_bounds = array<i64: 1, 4, 8, 128>}]} {
    %c0 = arith.constant 0 : index
    %c4 = arith.constant 4 : index
    %c0_0 = arith.constant 0 : index
    %c0_1 = arith.constant 0 : index
    %0 = vector.load %arg5[%c0, %c4, %c0_0, %c0_1] : memref<1x5x8x128xf32, #tpu.memory_space<vmem>>, vector<1x1x8x128xf32>
    %1 = vector.shape_cast %0 : vector<1x1x8x128xf32> to vector<8x128xf32>
    %cst = arith.constant 0.000000e+00 : f32
    %2 = vector.broadcast %cst : f32 to vector<8x128xf32>
    %3 = arith.cmpf ogt, %1, %2 : vector<8x128xf32>
    %4 = arith.extui %3 : vector<8x128xi1> to vector<8x128xi32>
    %5 = arith.sitofp %4 : vector<8x128xi32> to vector<8x128xf32>
    %c0_2 = arith.constant 0 : index
    %c0_3 = arith.constant 0 : index
    %c0_4 = arith.constant 0 : index
    %c0_5 = arith.constant 0 : index
    %6 = vector.load %arg2[%c0_2, %c0_3, %c0_4, %c0_5] : memref<1x8x8x128xf32, #tpu.memory_space<vmem>>, vector<1x4x8x128xf32>
    %7 = vector.shape_cast %6 : vector<1x4x8x128xf32> to vector<4x8x128xf32>
    %c0_6 = arith.constant 0 : index
    %c4_7 = arith.constant 4 : index
    %c0_8 = arith.constant 0 : index
    %c0_9 = arith.constant 0 : index
    %8 = vector.load %arg2[%c0_6, %c4_7, %c0_8, %c0_9] : memref<1x8x8x128xf32, #tpu.memory_space<vmem>>, vector<1x4x8x128xf32>
    %9 = vector.shape_cast %8 : vector<1x4x8x128xf32> to vector<4x8x128xf32>
    %10 = arith.subf %7, %9 : vector<4x8x128xf32>
    %11 = math.absf %10 : vector<4x8x128xf32>
    %cst_10 = arith.constant 1.000000e+00 : f32
    %12 = vector.broadcast %cst_10 : f32 to vector<4x8x128xf32>
    %13 = arith.cmpf olt, %11, %12 : vector<4x8x128xf32>
    %cst_11 = arith.constant 5.000000e-01 : f32
    %14 = vector.broadcast %cst_11 : f32 to vector<4x8x128xf32>
    %15 = arith.mulf %14, %10 : vector<4x8x128xf32>
    %16 = arith.mulf %15, %10 : vector<4x8x128xf32>
    %cst_12 = arith.constant 5.000000e-01 : f32
    %17 = vector.broadcast %cst_12 : f32 to vector<4x8x128xf32>
    %18 = arith.subf %11, %17 : vector<4x8x128xf32>
    %19 = arith.select %13, %16, %18 : vector<4x8x128xi1>, vector<4x8x128xf32>
    %cst_13 = arith.constant dense<0.000000e+00> : vector<8x128xf32>
    %20 = vector.multi_reduction <add>, %19, %cst_13 [0] : vector<4x8x128xf32> to vector<8x128xf32>
    %21 = arith.mulf %20, %5 : vector<8x128xf32>
    %c0_14 = arith.constant 0 : index
    %c0_15 = arith.constant 0 : index
    %c0_16 = arith.constant 0 : index
    %c0_17 = arith.constant 0 : index
    %22 = vector.load %arg7[%c0_14, %c0_15, %c0_16, %c0_17] : memref<1x4x8x128xf32, #tpu.memory_space<vmem>>, vector<1x1x8x128xf32>
    %23 = vector.shape_cast %22 : vector<1x1x8x128xf32> to vector<8x128xf32>
    %24 = vector.shape_cast %21 : vector<8x128xf32> to vector<1x1x8x128xf32>
    tpu.vector_store %arg7[%c0_14, %c0_15, %c0_16, %c0_17], %24 {strides = array<i32>} : memref<1x4x8x128xf32, #tpu.memory_space<vmem>>, vector<1x1x8x128xf32>,
    %c0_18 = arith.constant 0 : index
    %c0_19 = arith.constant 0 : index
    %c0_20 = arith.constant 0 : index
    %c0_21 = arith.constant 0 : index
    %25 = vector.load %arg3[%c0_18, %c0_19, %c0_20, %c0_21] : memref<1x8x8x128xf32, #tpu.memory_space<vmem>>, vector<1x8x8x128xf32>
    %26 = vector.shape_cast %25 : vector<1x8x8x128xf32> to vector<8x8x128xf32>
    %c0_22 = arith.constant 0 : index
    %c0_23 = arith.constant 0 : index
    %c0_24 = arith.constant 0 : index
    %c0_25 = arith.constant 0 : index
    %27 = vector.load %arg4[%c0_22, %c0_23, %c0_24, %c0_25] : memref<1x8x8x128xf32, #tpu.memory_space<vmem>>, vector<1x8x8x128xf32>
    %28 = vector.shape_cast %27 : vector<1x8x8x128xf32> to vector<8x8x128xf32>
    %29 = arith.subf %26, %28 : vector<8x8x128xf32>
    %30 = math.absf %29 : vector<8x8x128xf32>
    %cst_26 = arith.constant 1.000000e+00 : f32
    %31 = vector.broadcast %cst_26 : f32 to vector<8x8x128xf32>
    %32 = arith.cmpf olt, %30, %31 : vector<8x8x128xf32>
    %cst_27 = arith.constant 5.000000e-01 : f32
    %33 = vector.broadcast %cst_27 : f32 to vector<8x8x128xf32>
    %34 = arith.mulf %33, %29 : vector<8x8x128xf32>
    %35 = arith.mulf %34, %29 : vector<8x8x128xf32>
    %cst_28 = arith.constant 5.000000e-01 : f32
    %36 = vector.broadcast %cst_28 : f32 to vector<8x8x128xf32>
    %37 = arith.subf %30, %36 : vector<8x8x128xf32>
    %38 = arith.select %32, %35, %37 : vector<8x8x128xi1>, vector<8x8x128xf32>
    %cst_29 = arith.constant dense<0.000000e+00> : vector<8x128xf32>
    %39 = vector.multi_reduction <add>, %38, %cst_29 [0] : vector<8x8x128xf32> to vector<8x128xf32>
    %40 = arith.mulf %39, %5 : vector<8x128xf32>
    %c0_30 = arith.constant 0 : index
    %c1 = arith.constant 1 : index
    %c0_31 = arith.constant 0 : index
    %c0_32 = arith.constant 0 : index
    %41 = vector.load %arg7[%c0_30, %c1, %c0_31, %c0_32] : memref<1x4x8x128xf32, #tpu.memory_space<vmem>>, vector<1x1x8x128xf32>
    %42 = vector.shape_cast %41 : vector<1x1x8x128xf32> to vector<8x128xf32>
    %43 = vector.shape_cast %40 : vector<8x128xf32> to vector<1x1x8x128xf32>
    tpu.vector_store %arg7[%c0_30, %c1, %c0_31, %c0_32], %43 {strides = array<i32>} : memref<1x4x8x128xf32, #tpu.memory_space<vmem>>, vector<1x1x8x128xf32>,
    %c0_33 = arith.constant 0 : index
    %c0_34 = arith.constant 0 : index
    %c0_35 = arith.constant 0 : index
    %44 = vector.load %arg6[%c0_33, %c0_34, %c0_35] : memref<4x8x128xf32, #tpu.memory_space<vmem>>, vector<2x8x128xf32>
    %c2 = arith.constant 2 : index
    %c0_36 = arith.constant 0 : index
    %c0_37 = arith.constant 0 : index
    %45 = vector.load %arg6[%c2, %c0_36, %c0_37] : memref<4x8x128xf32, #tpu.memory_space<vmem>>, vector<2x8x128xf32>
    %46 = vector.extract_strided_slice %7 {offsets = [0, 0, 0], sizes = [2, 8, 128], strides = [1, 1, 1]} : vector<4x8x128xf32> to vector<2x8x128xf32>
    %cst_38 = arith.constant 1.000000e-01 : f32
    %47 = vector.broadcast %cst_38 : f32 to vector<2x8x128xf32>
    %48 = arith.mulf %47, %45 : vector<2x8x128xf32>
    %49 = arith.mulf %46, %48 : vector<2x8x128xf32>
    %50 = arith.addf %44, %49 : vector<2x8x128xf32>
    %51 = vector.extract_strided_slice %7 {offsets = [2, 0, 0], sizes = [2, 8, 128], strides = [1, 1, 1]} : vector<4x8x128xf32> to vector<2x8x128xf32>
    %cst_39 = arith.constant 2.000000e-01 : f32
    %52 = vector.broadcast %cst_39 : f32 to vector<2x8x128xf32>
    %53 = arith.mulf %51, %52 : vector<2x8x128xf32>
    %54 = math.exp %53 : vector<2x8x128xf32>
    %55 = arith.mulf %45, %54 : vector<2x8x128xf32>
    %cst_40 = arith.constant 5.000000e-01 : f32
    %56 = vector.broadcast %cst_40 : f32 to vector<2x8x128xf32>
    %57 = arith.mulf %56, %55 : vector<2x8x128xf32>
    %58 = arith.subf %50, %57 : vector<2x8x128xf32>
    %59 = arith.addf %58, %55 : vector<2x8x128xf32>
    %60 = vector.extract_strided_slice %58 {offsets = [0, 0, 0], sizes = [1, 8, 128], strides = [1, 1, 1]} : vector<2x8x128xf32> to vector<1x8x128xf32>
    %61 = vector.shape_cast %60 : vector<1x8x128xf32> to vector<8x128xf32>
    %62 = vector.extract_strided_slice %58 {offsets = [1, 0, 0], sizes = [1, 8, 128], strides = [1, 1, 1]} : vector<2x8x128xf32> to vector<1x8x128xf32>
    %63 = vector.shape_cast %62 : vector<1x8x128xf32> to vector<8x128xf32>
    %64 = vector.extract_strided_slice %59 {offsets = [0, 0, 0], sizes = [1, 8, 128], strides = [1, 1, 1]} : vector<2x8x128xf32> to vector<1x8x128xf32>
    %65 = vector.shape_cast %64 : vector<1x8x128xf32> to vector<8x128xf32>
    %66 = vector.extract_strided_slice %59 {offsets = [1, 0, 0], sizes = [1, 8, 128], strides = [1, 1, 1]} : vector<2x8x128xf32> to vector<1x8x128xf32>
    %67 = vector.shape_cast %66 : vector<1x8x128xf32> to vector<8x128xf32>
    %68 = vector.extract_strided_slice %55 {offsets = [0, 0, 0], sizes = [1, 8, 128], strides = [1, 1, 1]} : vector<2x8x128xf32> to vector<1x8x128xf32>
    %69 = vector.shape_cast %68 : vector<1x8x128xf32> to vector<8x128xf32>
    %70 = vector.extract_strided_slice %55 {offsets = [1, 0, 0], sizes = [1, 8, 128], strides = [1, 1, 1]} : vector<2x8x128xf32> to vector<1x8x128xf32>
    %71 = vector.shape_cast %70 : vector<1x8x128xf32> to vector<8x128xf32>
    %72 = vector.extract_strided_slice %44 {offsets = [0, 0, 0], sizes = [1, 8, 128], strides = [1, 1, 1]} : vector<2x8x128xf32> to vector<1x8x128xf32>
    %73 = vector.shape_cast %72 : vector<1x8x128xf32> to vector<8x128xf32>
    %74 = vector.shape_cast %73 : vector<8x128xf32> to vector<1x8x128xf32>
    %c0_41 = arith.constant 0 : index
    %c0_42 = arith.constant 0 : index
    %c0_43 = arith.constant 0 : index
    %c0_44 = arith.constant 0 : index
    %75 = vector.load %arg3[%c0_41, %c0_42, %c0_43, %c0_44] : memref<1x8x8x128xf32, #tpu.memory_space<vmem>>, vector<1x4x8x128xf32>
    %76 = vector.shape_cast %75 : vector<1x4x8x128xf32> to vector<4x8x128xf32>
    %77 = vector.extract_strided_slice %45 {offsets = [0, 0, 0], sizes = [1, 8, 128], strides = [1, 1, 1]} : vector<2x8x128xf32> to vector<1x8x128xf32>
    %78 = vector.shape_cast %77 : vector<1x8x128xf32> to vector<8x128xf32>
    %cst_45 = arith.constant 1.000000e-01 : f32
    %79 = vector.broadcast %cst_45 : f32 to vector<8x128xf32>
    %80 = arith.mulf %79, %78 : vector<8x128xf32>
    %81 = vector.shape_cast %80 : vector<8x128xf32> to vector<1x8x128xf32>
    %82 = vector.broadcast %81 : vector<1x8x128xf32> to vector<4x8x128xf32>
    %83 = arith.mulf %76, %82 : vector<4x8x128xf32>
    %84 = vector.broadcast %74 : vector<1x8x128xf32> to vector<4x8x128xf32>
    %85 = arith.addf %84, %83 : vector<4x8x128xf32>
    %86 = vector.extract_strided_slice %44 {offsets = [1, 0, 0], sizes = [1, 8, 128], strides = [1, 1, 1]} : vector<2x8x128xf32> to vector<1x8x128xf32>
    %87 = vector.shape_cast %86 : vector<1x8x128xf32> to vector<8x128xf32>
    %88 = vector.shape_cast %87 : vector<8x128xf32> to vector<1x8x128xf32>
    %c0_46 = arith.constant 0 : index
    %c4_47 = arith.constant 4 : index
    %c0_48 = arith.constant 0 : index
    %c0_49 = arith.constant 0 : index
    %89 = vector.load %arg3[%c0_46, %c4_47, %c0_48, %c0_49] : memref<1x8x8x128xf32, #tpu.memory_space<vmem>>, vector<1x4x8x128xf32>
    %90 = vector.shape_cast %89 : vector<1x4x8x128xf32> to vector<4x8x128xf32>
    %91 = vector.extract_strided_slice %45 {offsets = [1, 0, 0], sizes = [1, 8, 128], strides = [1, 1, 1]} : vector<2x8x128xf32> to vector<1x8x128xf32>
    %92 = vector.shape_cast %91 : vector<1x8x128xf32> to vector<8x128xf32>
    %cst_50 = arith.constant 1.000000e-01 : f32
    %93 = vector.broadcast %cst_50 : f32 to vector<8x128xf32>
    %94 = arith.mulf %93, %92 : vector<8x128xf32>
    %95 = vector.shape_cast %94 : vector<8x128xf32> to vector<1x8x128xf32>
    %96 = vector.broadcast %95 : vector<1x8x128xf32> to vector<4x8x128xf32>
    %97 = arith.mulf %90, %96 : vector<4x8x128xf32>
    %98 = vector.broadcast %88 : vector<1x8x128xf32> to vector<4x8x128xf32>
    %99 = arith.addf %98, %97 : vector<4x8x128xf32>
    %100 = vector.extract_strided_slice %85 {offsets = [0, 0, 0], sizes = [1, 8, 128], strides = [1, 1, 1]} : vector<4x8x128xf32> to vector<1x8x128xf32>
    %101 = vector.shape_cast %100 : vector<1x8x128xf32> to vector<8x128xf32>
    %102 = vector.extract_strided_slice %85 {offsets = [3, 0, 0], sizes = [1, 8, 128], strides = [1, 1, 1]} : vector<4x8x128xf32> to vector<1x8x128xf32>
    %103 = vector.shape_cast %102 : vector<1x8x128xf32> to vector<8x128xf32>
    %104 = arith.minimumf %101, %103 : vector<8x128xf32>
    %105 = vector.extract_strided_slice %99 {offsets = [0, 0, 0], sizes = [1, 8, 128], strides = [1, 1, 1]} : vector<4x8x128xf32> to vector<1x8x128xf32>
    %106 = vector.shape_cast %105 : vector<1x8x128xf32> to vector<8x128xf32>
    %107 = vector.extract_strided_slice %99 {offsets = [1, 0, 0], sizes = [1, 8, 128], strides = [1, 1, 1]} : vector<4x8x128xf32> to vector<1x8x128xf32>
    %108 = vector.shape_cast %107 : vector<1x8x128xf32> to vector<8x128xf32>
    %109 = arith.minimumf %106, %108 : vector<8x128xf32>
    %110 = vector.extract_strided_slice %85 {offsets = [1, 0, 0], sizes = [1, 8, 128], strides = [1, 1, 1]} : vector<4x8x128xf32> to vector<1x8x128xf32>
    %111 = vector.shape_cast %110 : vector<1x8x128xf32> to vector<8x128xf32>
    %112 = vector.extract_strided_slice %85 {offsets = [2, 0, 0], sizes = [1, 8, 128], strides = [1, 1, 1]} : vector<4x8x128xf32> to vector<1x8x128xf32>
    %113 = vector.shape_cast %112 : vector<1x8x128xf32> to vector<8x128xf32>
    %114 = arith.maximumf %111, %113 : vector<8x128xf32>
    %115 = vector.extract_strided_slice %99 {offsets = [2, 0, 0], sizes = [1, 8, 128], strides = [1, 1, 1]} : vector<4x8x128xf32> to vector<1x8x128xf32>
    %116 = vector.shape_cast %115 : vector<1x8x128xf32> to vector<8x128xf32>
    %117 = vector.extract_strided_slice %99 {offsets = [3, 0, 0], sizes = [1, 8, 128], strides = [1, 1, 1]} : vector<4x8x128xf32> to vector<1x8x128xf32>
    %118 = vector.shape_cast %117 : vector<1x8x128xf32> to vector<8x128xf32>
    %119 = arith.maximumf %116, %118 : vector<8x128xf32>
    %120 = arith.subf %114, %104 : vector<8x128xf32>
    %121 = arith.subf %119, %109 : vector<8x128xf32>
    %122 = arith.mulf %120, %121 : vector<8x128xf32>
    %123 = arith.mulf %69, %71 : vector<8x128xf32>
    %124 = arith.addf %104, %114 : vector<8x128xf32>
    %cst_51 = arith.constant 5.000000e-01 : f32
    %125 = vector.broadcast %cst_51 : f32 to vector<8x128xf32>
    %126 = arith.mulf %125, %124 : vector<8x128xf32>
    %127 = arith.addf %109, %119 : vector<8x128xf32>
    %cst_52 = arith.constant 5.000000e-01 : f32
    %128 = vector.broadcast %cst_52 : f32 to vector<8x128xf32>
    %129 = arith.mulf %128, %127 : vector<8x128xf32>
    %130 = vector.extract_strided_slice %50 {offsets = [0, 0, 0], sizes = [1, 8, 128], strides = [1, 1, 1]} : vector<2x8x128xf32> to vector<1x8x128xf32>
    %131 = vector.shape_cast %130 : vector<1x8x128xf32> to vector<8x128xf32>
    %132 = vector.extract_strided_slice %50 {offsets = [1, 0, 0], sizes = [1, 8, 128], strides = [1, 1, 1]} : vector<2x8x128xf32> to vector<1x8x128xf32>
    %133 = vector.shape_cast %132 : vector<1x8x128xf32> to vector<8x128xf32>
    %134 = arith.minimumf %114, %65 : vector<8x128xf32>
    %135 = arith.maximumf %104, %61 : vector<8x128xf32>
    %136 = arith.subf %134, %135 : vector<8x128xf32>
    %cst_53 = arith.constant 0.000000e+00 : f32
    %137 = vector.broadcast %cst_53 : f32 to vector<8x128xf32>
    %138 = arith.maximumf %136, %137 : vector<8x128xf32>
    %139 = arith.minimumf %119, %67 : vector<8x128xf32>
    %140 = arith.maximumf %109, %63 : vector<8x128xf32>
    %141 = arith.subf %139, %140 : vector<8x128xf32>
    %cst_54 = arith.constant 0.000000e+00 : f32
    %142 = vector.broadcast %cst_54 : f32 to vector<8x128xf32>
    %143 = arith.maximumf %141, %142 : vector<8x128xf32>
    %144 = arith.mulf %138, %143 : vector<8x128xf32>
    %145 = arith.maximumf %114, %65 : vector<8x128xf32>
    %146 = arith.minimumf %104, %61 : vector<8x128xf32>
    %147 = arith.subf %145, %146 : vector<8x128xf32>
    %cst_55 = arith.constant 0.000000e+00 : f32
    %148 = vector.broadcast %cst_55 : f32 to vector<8x128xf32>
    %149 = arith.maximumf %147, %148 : vector<8x128xf32>
    %150 = arith.maximumf %119, %67 : vector<8x128xf32>
    %151 = arith.minimumf %109, %63 : vector<8x128xf32>
    %152 = arith.subf %150, %151 : vector<8x128xf32>
    %cst_56 = arith.constant 0.000000e+00 : f32
    %153 = vector.broadcast %cst_56 : f32 to vector<8x128xf32>
    %154 = arith.maximumf %152, %153 : vector<8x128xf32>
    %155 = arith.mulf %149, %149 : vector<8x128xf32>
    %156 = arith.mulf %154, %154 : vector<8x128xf32>
    %157 = arith.addf %155, %156 : vector<8x128xf32>
    %158 = arith.subf %131, %126 : vector<8x128xf32>
    %159 = arith.subf %131, %126 : vector<8x128xf32>
    %160 = arith.mulf %158, %159 : vector<8x128xf32>
    %161 = arith.subf %133, %129 : vector<8x128xf32>
    %162 = arith.subf %133, %129 : vector<8x128xf32>
    %163 = arith.mulf %161, %162 : vector<8x128xf32>
    %164 = arith.addf %160, %163 : vector<8x128xf32>
    %165 = arith.addf %122, %123 : vector<8x128xf32>
    %166 = arith.subf %165, %144 : vector<8x128xf32>
    %cst_57 = arith.constant 9.99999971E-10 : f32
    %167 = vector.broadcast %cst_57 : f32 to vector<8x128xf32>
    %168 = arith.maximumf %166, %167 : vector<8x128xf32>
    %169 = arith.divf %144, %168 : vector<8x128xf32>
    %cst_58 = arith.constant 9.99999971E-10 : f32
    %170 = vector.broadcast %cst_58 : f32 to vector<8x128xf32>
    %171 = arith.maximumf %157, %170 : vector<8x128xf32>
    %172 = arith.divf %164, %171 : vector<8x128xf32>
    %173 = math.absf %121 : vector<8x128xf32>
    %cst_59 = arith.constant 9.99999971E-10 : f32
    %174 = vector.broadcast %cst_59 : f32 to vector<8x128xf32>
    %175 = arith.maximumf %173, %174 : vector<8x128xf32>
    %176 = tpu.reciprocal %175 {approx = true} : vector<8x128xf32> -> vector<8x128xf32>
    %cst_60 = arith.constant 0.000000e+00 : f32
    %177 = vector.broadcast %cst_60 : f32 to vector<8x128xf32>
    %178 = arith.cmpf olt, %121, %177 : vector<8x128xf32>
    %cst_61 = arith.constant 0.000000e+00 : f32
    %179 = vector.broadcast %cst_61 : f32 to vector<8x128xf32>
    %180 = arith.subf %179, %120 : vector<8x128xf32>
    %181 = arith.mulf %180, %176 : vector<8x128xf32>
    %182 = arith.mulf %120, %176 : vector<8x128xf32>
    %183 = arith.select %178, %181, %182 : vector<8x128xi1>, vector<8x128xf32>
    %cst_62 = arith.constant 9.99999971E-10 : f32
    %184 = vector.broadcast %cst_62 : f32 to vector<8x128xf32>
    %185 = arith.maximumf %71, %184 : vector<8x128xf32>
    %186 = tpu.reciprocal %185 {approx = true} : vector<8x128xf32> -> vector<8x128xf32>
    %187 = arith.mulf %69, %186 : vector<8x128xf32>
    %188 = arith.subf %187, %183 : vector<8x128xf32>
    %189 = arith.mulf %183, %187 : vector<8x128xf32>
    %cst_63 = arith.constant 1.000000e+00 : f32
    %190 = vector.broadcast %cst_63 : f32 to vector<8x128xf32>
    %191 = arith.addf %190, %189 : vector<8x128xf32>
    %192 = math.absf %191 : vector<8x128xf32>
    %cst_64 = arith.constant 9.99999971E-10 : f32
    %193 = vector.broadcast %cst_64 : f32 to vector<8x128xf32>
    %194 = arith.maximumf %192, %193 : vector<8x128xf32>
    %195 = tpu.reciprocal %194 {approx = true} : vector<8x128xf32> -> vector<8x128xf32>
    %cst_65 = arith.constant 0.000000e+00 : f32
    %196 = vector.broadcast %cst_65 : f32 to vector<8x128xf32>
    %197 = arith.cmpf olt, %191, %196 : vector<8x128xf32>
    %cst_66 = arith.constant 0.000000e+00 : f32
    %198 = vector.broadcast %cst_66 : f32 to vector<8x128xf32>
    %199 = arith.subf %198, %188 : vector<8x128xf32>
    %200 = arith.mulf %199, %195 : vector<8x128xf32>
    %201 = arith.mulf %188, %195 : vector<8x128xf32>
    %202 = arith.select %197, %200, %201 : vector<8x128xi1>, vector<8x128xf32>
    %203 = math.absf %202 : vector<8x128xf32>
    %cst_67 = arith.constant 1.000000e+00 : f32
    %204 = vector.broadcast %cst_67 : f32 to vector<8x128xf32>
    %205 = arith.cmpf ogt, %203, %204 : vector<8x128xf32>
    %cst_68 = arith.constant 9.99999968E-21 : f32
    %206 = vector.broadcast %cst_68 : f32 to vector<8x128xf32>
    %207 = arith.maximumf %203, %206 : vector<8x128xf32>
    %208 = tpu.reciprocal %207 {approx = true} : vector<8x128xf32> -> vector<8x128xf32>
    %209 = arith.select %205, %208, %203 : vector<8x128xi1>, vector<8x128xf32>
    %210 = arith.mulf %209, %209 : vector<8x128xf32>
    %cst_69 = arith.constant -1.172120e-02 : f32
    %211 = vector.broadcast %cst_69 : f32 to vector<8x128xf32>
    %212 = arith.mulf %210, %211 : vector<8x128xf32>
    %cst_70 = arith.constant 0.0526533201 : f32
    %213 = vector.broadcast %cst_70 : f32 to vector<8x128xf32>
    %214 = arith.addf %213, %212 : vector<8x128xf32>
    %215 = arith.mulf %210, %214 : vector<8x128xf32>
    %cst_71 = arith.constant -0.116432868 : f32
    %216 = vector.broadcast %cst_71 : f32 to vector<8x128xf32>
    %217 = arith.addf %216, %215 : vector<8x128xf32>
    %218 = arith.mulf %210, %217 : vector<8x128xf32>
    %cst_72 = arith.constant 0.193543464 : f32
    %219 = vector.broadcast %cst_72 : f32 to vector<8x128xf32>
    %220 = arith.addf %219, %218 : vector<8x128xf32>
    %221 = arith.mulf %210, %220 : vector<8x128xf32>
    %cst_73 = arith.constant -0.332623482 : f32
    %222 = vector.broadcast %cst_73 : f32 to vector<8x128xf32>
    %223 = arith.addf %222, %221 : vector<8x128xf32>
    %224 = arith.mulf %210, %223 : vector<8x128xf32>
    %cst_74 = arith.constant 0.999977231 : f32
    %225 = vector.broadcast %cst_74 : f32 to vector<8x128xf32>
    %226 = arith.addf %225, %224 : vector<8x128xf32>
    %227 = arith.mulf %209, %226 : vector<8x128xf32>
    %cst_75 = arith.constant 1.57079637 : f32
    %228 = vector.broadcast %cst_75 : f32 to vector<8x128xf32>
    %229 = arith.subf %228, %227 : vector<8x128xf32>
    %230 = arith.select %205, %229, %227 : vector<8x128xi1>, vector<8x128xf32>
    %cst_76 = arith.constant 0.000000e+00 : f32
    %231 = vector.broadcast %cst_76 : f32 to vector<8x128xf32>
    %232 = arith.cmpf olt, %202, %231 : vector<8x128xf32>
    %cst_77 = arith.constant 0.000000e+00 : f32
    %233 = vector.broadcast %cst_77 : f32 to vector<8x128xf32>
    %234 = arith.subf %233, %230 : vector<8x128xf32>
    %235 = arith.select %232, %234, %230 : vector<8x128xi1>, vector<8x128xf32>
    %cst_78 = arith.constant 0.000000e+00 : f32
    %236 = vector.broadcast %cst_78 : f32 to vector<8x128xf32>
    %237 = arith.cmpf olt, %191, %236 : vector<8x128xf32>
    %cst_79 = arith.constant 0.000000e+00 : f32
    %238 = vector.broadcast %cst_79 : f32 to vector<8x128xf32>
    %239 = arith.cmpf oge, %188, %238 : vector<8x128xf32>
    %cst_80 = arith.constant 3.14159274 : f32
    %cst_81 = arith.constant -3.14159274 : f32
    %240 = vector.broadcast %cst_80 : f32 to vector<8x128xf32>
    %241 = vector.broadcast %cst_81 : f32 to vector<8x128xf32>
    %242 = arith.select %239, %240, %241 : vector<8x128xi1>, vector<8x128xf32>
    %cst_82 = arith.constant 0.000000e+00 : f32
    %243 = vector.broadcast %cst_82 : f32 to vector<8x128xf32>
    %244 = arith.select %237, %242, %243 : vector<8x128xi1>, vector<8x128xf32>
    %245 = arith.addf %235, %244 : vector<8x128xf32>
    %cst_83 = arith.constant 0.405284733 : f32
    %246 = vector.broadcast %cst_83 : f32 to vector<8x128xf32>
    %247 = arith.mulf %246, %245 : vector<8x128xf32>
    %248 = arith.mulf %247, %245 : vector<8x128xf32>
    %cst_84 = arith.constant 1.000000e+00 : f32
    %249 = vector.broadcast %cst_84 : f32 to vector<8x128xf32>
    %250 = arith.subf %249, %169 : vector<8x128xf32>
    %251 = arith.addf %250, %248 : vector<8x128xf32>
    %cst_85 = arith.constant 9.99999971E-10 : f32
    %252 = vector.broadcast %cst_85 : f32 to vector<8x128xf32>
    %253 = arith.addf %251, %252 : vector<8x128xf32>
    %254 = tpu.reciprocal %253 {approx = true} : vector<8x128xf32> -> vector<8x128xf32>
    %255 = arith.mulf %248, %254 : vector<8x128xf32>
    %256 = arith.mulf %255, %248 : vector<8x128xf32>
    %257 = arith.addf %172, %256 : vector<8x128xf32>
    %258 = arith.subf %169, %257 : vector<8x128xf32>
    %cst_86 = arith.constant -1.000000e+00 : f32
    %cst_87 = arith.constant 1.000000e+00 : f32
    %259 = vector.broadcast %cst_86 : f32 to vector<8x128xf32>
    %260 = arith.maximumf %259, %258 : vector<8x128xf32>
    %261 = vector.broadcast %cst_87 : f32 to vector<8x128xf32>
    %262 = arith.minimumf %261, %260 : vector<8x128xf32>
    %cst_88 = arith.constant 0.000000e+00 : f32
    %263 = vector.broadcast %cst_88 : f32 to vector<8x128xf32>
    %264 = arith.cmpf ogt, %1, %263 : vector<8x128xf32>
    %cst_89 = arith.constant 1.000000e+00 : f32
    %265 = vector.broadcast %cst_89 : f32 to vector<8x128xf32>
    %266 = arith.subf %265, %262 : vector<8x128xf32>
    %cst_90 = arith.constant 0.000000e+00 : f32
    %267 = vector.broadcast %cst_90 : f32 to vector<8x128xf32>
    %268 = arith.select %264, %266, %267 : vector<8x128xi1>, vector<8x128xf32>
    %c0_91 = arith.constant 0 : index
    %c2_92 = arith.constant 2 : index
    %c0_93 = arith.constant 0 : index
    %c0_94 = arith.constant 0 : index
    %269 = vector.load %arg7[%c0_91, %c2_92, %c0_93, %c0_94] : memref<1x4x8x128xf32, #tpu.memory_space<vmem>>, vector<1x1x8x128xf32>
    %270 = vector.shape_cast %269 : vector<1x1x8x128xf32> to vector<8x128xf32>
    %271 = vector.shape_cast %268 : vector<8x128xf32> to vector<1x1x8x128xf32>
    tpu.vector_store %arg7[%c0_91, %c2_92, %c0_93, %c0_94], %271 {strides = array<i32>} : memref<1x4x8x128xf32, #tpu.memory_space<vmem>>, vector<1x1x8x128xf32>,
    %c0_95 = arith.constant 0 : index
    %c0_96 = arith.constant 0 : index
    %c0_97 = arith.constant 0 : index
    %c0_98 = arith.constant 0 : index
    %272 = vector.load %arg5[%c0_95, %c0_96, %c0_97, %c0_98] : memref<1x5x8x128xf32, #tpu.memory_space<vmem>>, vector<1x4x8x128xf32>
    %273 = vector.shape_cast %272 : vector<1x4x8x128xf32> to vector<4x8x128xf32>
    %cst_99 = arith.constant dense<0xFF800000> : vector<8x128xf32>
    %274 = vector.multi_reduction <maximumf>, %273, %cst_99 [0] : vector<4x8x128xf32> to vector<8x128xf32>
    %275 = vector.shape_cast %274 : vector<8x128xf32> to vector<1x8x128xf32>
    %276 = vector.broadcast %275 : vector<1x8x128xf32> to vector<4x8x128xf32>
    %277 = arith.subf %273, %276 : vector<4x8x128xf32>
    %278 = math.exp %277 : vector<4x8x128xf32>
    %cst_100 = arith.constant dense<0.000000e+00> : vector<8x128xf32>
    %279 = vector.multi_reduction <add>, %278, %cst_100 [0] : vector<4x8x128xf32> to vector<8x128xf32>
    %280 = math.log %279 : vector<8x128xf32>
    %281 = arith.addf %280, %274 : vector<8x128xf32>
    %cst_101 = arith.constant 0.000000e+00 : f32
    %282 = vector.broadcast %cst_101 : f32 to vector<8x128xf32>
    %cst_102 = arith.constant 0.000000e+00 : f32
    %283 = vector.broadcast %cst_102 : f32 to vector<8x128xf32>
    %284 = arith.cmpf oeq, %1, %283 : vector<8x128xf32>
    %285 = vector.extract_strided_slice %273 {offsets = [0, 0, 0], sizes = [1, 8, 128], strides = [1, 1, 1]} : vector<4x8x128xf32> to vector<1x8x128xf32>
    %286 = vector.shape_cast %285 : vector<1x8x128xf32> to vector<8x128xf32>
    %cst_103 = arith.constant 0.000000e+00 : f32
    %287 = vector.broadcast %cst_103 : f32 to vector<8x128xf32>
    %288 = arith.select %284, %286, %287 : vector<8x128xi1>, vector<8x128xf32>
    %289 = arith.addf %282, %288 : vector<8x128xf32>
    %cst_104 = arith.constant 1.000000e+00 : f32
    %290 = vector.broadcast %cst_104 : f32 to vector<8x128xf32>
    %291 = arith.cmpf oeq, %1, %290 : vector<8x128xf32>
    %292 = vector.extract_strided_slice %273 {offsets = [1, 0, 0], sizes = [1, 8, 128], strides = [1, 1, 1]} : vector<4x8x128xf32> to vector<1x8x128xf32>
    %293 = vector.shape_cast %292 : vector<1x8x128xf32> to vector<8x128xf32>
    %cst_105 = arith.constant 0.000000e+00 : f32
    %294 = vector.broadcast %cst_105 : f32 to vector<8x128xf32>
    %295 = arith.select %291, %293, %294 : vector<8x128xi1>, vector<8x128xf32>
    %296 = arith.addf %289, %295 : vector<8x128xf32>
    %cst_106 = arith.constant 2.000000e+00 : f32
    %297 = vector.broadcast %cst_106 : f32 to vector<8x128xf32>
    %298 = arith.cmpf oeq, %1, %297 : vector<8x128xf32>
    %299 = vector.extract_strided_slice %273 {offsets = [2, 0, 0], sizes = [1, 8, 128], strides = [1, 1, 1]} : vector<4x8x128xf32> to vector<1x8x128xf32>
    %300 = vector.shape_cast %299 : vector<1x8x128xf32> to vector<8x128xf32>
    %cst_107 = arith.constant 0.000000e+00 : f32
    %301 = vector.broadcast %cst_107 : f32 to vector<8x128xf32>
    %302 = arith.select %298, %300, %301 : vector<8x128xi1>, vector<8x128xf32>
    %303 = arith.addf %296, %302 : vector<8x128xf32>
    %cst_108 = arith.constant 3.000000e+00 : f32
    %304 = vector.broadcast %cst_108 : f32 to vector<8x128xf32>
    %305 = arith.cmpf oeq, %1, %304 : vector<8x128xf32>
    %306 = vector.extract_strided_slice %273 {offsets = [3, 0, 0], sizes = [1, 8, 128], strides = [1, 1, 1]} : vector<4x8x128xf32> to vector<1x8x128xf32>
    %307 = vector.shape_cast %306 : vector<1x8x128xf32> to vector<8x128xf32>
    %cst_109 = arith.constant 0.000000e+00 : f32
    %308 = vector.broadcast %cst_109 : f32 to vector<8x128xf32>
    %309 = arith.select %305, %307, %308 : vector<8x128xi1>, vector<8x128xf32>
    %310 = arith.addf %303, %309 : vector<8x128xf32>
    %311 = arith.subf %281, %310 : vector<8x128xf32>
    %c0_110 = arith.constant 0 : index
    %c3 = arith.constant 3 : index
    %c0_111 = arith.constant 0 : index
    %c0_112 = arith.constant 0 : index
    %312 = vector.load %arg7[%c0_110, %c3, %c0_111, %c0_112] : memref<1x4x8x128xf32, #tpu.memory_space<vmem>>, vector<1x1x8x128xf32>
    %313 = vector.shape_cast %312 : vector<1x1x8x128xf32> to vector<8x128xf32>
    %314 = vector.shape_cast %311 : vector<8x128xf32> to vector<1x1x8x128xf32>
    tpu.vector_store %arg7[%c0_110, %c3, %c0_111, %c0_112], %314 {strides = array<i32>} : memref<1x4x8x128xf32, #tpu.memory_space<vmem>>, vector<1x1x8x128xf32>,
    return
  }
  func.func @transform_0(%arg0: i32, %arg1: i32) -> (i32, i32, i32, i32) {
    %c0_i32 = arith.constant 0 : i32
    %c0_i32_0 = arith.constant 0 : i32
    %c0_i32_1 = arith.constant 0 : i32
    return %arg1, %c0_i32, %arg0, %c0_i32_0 : i32, i32, i32, i32
  }
  func.func @transform_1(%arg0: i32, %arg1: i32) -> (i32, i32, i32, i32) {
    %c0_i32 = arith.constant 0 : i32
    %c0_i32_0 = arith.constant 0 : i32
    %c0_i32_1 = arith.constant 0 : i32
    return %arg1, %c0_i32, %arg0, %c0_i32_0 : i32, i32, i32, i32
  }
  func.func @transform_2(%arg0: i32, %arg1: i32) -> (i32, i32, i32, i32) {
    %c0_i32 = arith.constant 0 : i32
    %c0_i32_0 = arith.constant 0 : i32
    %c0_i32_1 = arith.constant 0 : i32
    return %arg1, %c0_i32, %arg0, %c0_i32_0 : i32, i32, i32, i32
  }
  func.func @transform_3(%arg0: i32, %arg1: i32) -> (i32, i32, i32, i32) {
    %c0_i32 = arith.constant 0 : i32
    %c0_i32_0 = arith.constant 0 : i32
    %c0_i32_1 = arith.constant 0 : i32
    return %arg1, %c0_i32, %arg0, %c0_i32_0 : i32, i32, i32, i32
  }
  func.func @transform_4(%arg0: i32, %arg1: i32) -> (i32, i32, i32) {
    %c0_i32 = arith.constant 0 : i32
    %c0_i32_0 = arith.constant 0 : i32
    %c0_i32_1 = arith.constant 0 : i32
    return %c0_i32, %arg0, %c0_i32_0 : i32, i32, i32
  }
  func.func @transform_5(%arg0: i32, %arg1: i32) -> (i32, i32, i32, i32) {
    %c0_i32 = arith.constant 0 : i32
    %c0_i32_0 = arith.constant 0 : i32
    %c0_i32_1 = arith.constant 0 : i32
    return %arg1, %c0_i32, %arg0, %c0_i32_0 : i32, i32, i32, i32
  }
}

</mosaic_0001>

<bundles_post_ra>
// kernel: _lambda_.1
= control target key start
LH: loop header
LB: loop body
LE: loop exit
PB: predicated region body
PF: predicated region fallthrough
CT: control target
= control target key end

     0   :  { %s1007_s18 = smov 0   ;;  %s1009_s19 = smov 0   ;;  %s1330_s0 = inlined_call_operand.vmem [shape: f32[2,8,8,128], index: 0, kind: input, shape index: {}]   ;;  %s1331_s1 = inlined_call_operand.vmem [shape: f32[2,8,8,128], index: 1, kind: input, shape index: {}]   ;;  %s1332_s2 = inlined_call_operand.vmem [shape: f32[2,8,8,128], index: 2, kind: input, shape index: {}]   ;;  %s1333_s3 = inlined_call_operand.vmem [shape: f32[2,5,8,128], index: 3, kind: input, shape index: {}]   ;;  %s1334_s4 = inlined_call_operand.vmem [shape: f32[4,8,128], index: 4, kind: input, shape index: {}]   ;;  %s1335_s5 = inlined_call_operand.vmem [shape: f32[2,4,8,128], index: 5, kind: output, shape index: {}]  }
   0x1   :  { %s1011_s20 = smov 0  }
   0x2 LB: > { %s24_s21 = sadd.s32 1, %s969_s19  ;;  %p852_p0 = scmp.ge.s32.totalorder %s973_s20, 1  ;;  %s973_s20 = sphi %s1011_s20, %s15_s20   ;;  %s969_s19 = sphi %s1009_s19, %s1361_s19   ;;  %s965_s18 = sphi %s1007_s18, %s1360_s18  }
   0x3   : > { %p25_p1 = scmp.ge.s32.totalorder %s24_s21, 2  ;;  %p260_p2 = scmp.lt.s32.totalorder %s973_s20, 3 }
   0x5   : > { %s1363_s21 = smov (%p25_p1, %s24_s21), 0  ;;  %p261_p3 = pnand %p852_p0, %p260_p2 }
   0x6   : > { %p322_p4 = scmp.lt.s32.totalorder (!%p261_p3), %s965_s18, 1  ;;  %v1030_v0 = vld [vmem:[%s1334_s4 + $0x18] sm:$0xff] (!%p261_p3)  ;;  %v1042_v4 = vld [vmem:[%s1334_s4 + $0x10] sm:$0xff] (!%p261_p3)  ;;  %v1051_v16 = vld [vmem:[%s1334_s4 + $0x8] sm:$0xff] (!%p261_p3) }
   0x7   : > { %264 = sbr.rel (%p261_p3) target bundleno = 177 (0xb1), region = 40  ;;  %v1037_v1 = vmul.f32 (!%p261_p3), 0.1, %v1030_v0  ;;  %v1054_v17 = vmul.f32 (!%p261_p3), 0.1, %v1042_v4 }
   0xe   : > { %s1365_s18 = smov (!%p322_p4, %s965_s18), 1 }
   0xf   : > { %s892_s24 = sshll.u32 %s1365_s18, 6  ;;  %s896_s10 = smul.u32 40, %s1365_s18 }
  0x10   : > { %s329_s27 = scalar_lea.vmem %s1330_s0, %s892_s24  ;;  %s1059_s9 = scalar_lea.vmem %s1332_s2, %s892_s24 }
  0x11   : > { %v371_v2 = vld [vmem:[%s329_s27] sm:$0xff]  ;;  %v372_v3 = vld [vmem:[%s329_s27 + $0x8] sm:$0xff]  ;;  %v373_v5 = vld [vmem:[%s329_s27 + $0x10] sm:$0xff]  ;;  %s1070_s13 = scalar_lea.vmem %s1331_s1, %s892_s24  ;;  %s1109_s16 = scalar_lea.vmem %s1333_s3, %s896_s10 }
  0x12   : > { %v1044_v6 = vld [vmem:[%s329_s27 + $0x18] sm:$0xff]  ;;  %v864_v7 = vld [vmem:[%s329_s27 + $0x20] sm:$0xff]  ;;  %v503_v8 = vmul.f32 %v1037_v1, %v372_v3  ;;  %v865_v9 = vld [vmem:[%s329_s27 + $0x28] sm:$0xff]  ;;  %v1065_v21 = vmul.f32 0.2, %v373_v5  ;;  %v1073_v25 = vmul.f32 %v1054_v17, %v371_v2  ;;  %s895_s17 = sshll.u32 %s1365_s18, 5 }
  0x13   : > { %v866_v10 = vld [vmem:[%s329_s27 + $0x30] sm:$0xff]  ;;  %v867_v11 = vld [vmem:[%s329_s27 + $0x38] sm:$0xff]  ;;  %v380_v12 = vsub.f32 %v371_v2, %v864_v7  ;;  %v381_v13 = vsub.f32 %v372_v3, %v865_v9  ;;  %v413_v30 = vld [vmem:[%s1070_s13] sm:$0xff]  ;;  %s1162_s23 = scalar_lea.vmem %s1335_s5, %s895_s17 }
  0x14   : > { %v382_v14 = vsub.f32 %v373_v5, %v866_v10  ;;  %v383_v15 = vsub.f32 %v1044_v6, %v867_v11  ;;  %v1063_v20 = vadd.f32 %v503_v8, %v1051_v16  ;;  %v414_v35 = vld [vmem:[%s1070_s13 + $0x8] sm:$0xff]  ;;  %v1094_v36 = vld [vmem:[%s1070_s13 + $0x10] sm:$0xff]  ;;  %v421_v37 = vld [vmem:[%s1059_s9] sm:$0xff]  ;;  %v524_v26 = vmul.f32 %v1054_v17, %v413_v30 }
  0x15   : > { %v384_v18 = vand.u32 2147483647, %v380_v12  ;;  %v392_v19 = vmul.f32 0.5, %v380_v12  ;;  %v385_v22 = vand.u32 2147483647, %v381_v13  ;;  %v393_v27 = vmul.f32 0.5, %v381_v13 }
  0x16   : > { %v386_v23 = vand.u32 2147483647, %v382_v14  ;;  %v387_v24 = vand.u32 2147483647, %v383_v15  ;;  %v394_v28 = vmul.f32 0.5, %v382_v14  ;;  %v395_v29 = vmul.f32 0.5, %v383_v15 }
  0x17   : > { %vm1075_vm0 = vcmp.lt.f32.partialorder %v384_v18, 1.0  ;;  %vm1080_vm1 = vcmp.lt.f32.partialorder %v385_v22, 1.0  ;;  %v396_v34 = vmul.f32 %v392_v19, %v380_v12  ;;  %v422_v38 = vld [vmem:[%s1059_s9 + $0x8] sm:$0xff]  ;;  %v423_v39 = vld [vmem:[%s1059_s9 + $0x10] sm:$0xff]  ;;  %v397_v40 = vmul.f32 %v393_v27, %v381_v13  ;;  %v1100_v44 = vld [vmem:[%s1070_s13 + $0x18] sm:$0xff] }
  0x18   : > { %vm1084_vm2 = vcmp.lt.f32.partialorder %v386_v23, 1.0  ;;  %vm1088_vm3 = vcmp.lt.f32.partialorder %v387_v24, 1.0  ;;  %v398_v41 = vmul.f32 %v394_v28, %v382_v14  ;;  %v399_v42 = vmul.f32 %v395_v29, %v383_v15  ;;  %v424_v45 = vld [vmem:[%s1059_s9 + $0x18] sm:$0xff]  ;;  %v425_v46 = vld [vmem:[%s1059_s9 + $0x20] sm:$0xff]  ;;  %v426_v50 = vld [vmem:[%s1059_s9 + $0x28] sm:$0xff] }
  0x19   : > { %v868_v43 = vadd.f32 -0.5, %v384_v18  ;;  %v869_v47 = vadd.f32 -0.5, %v385_v22  ;;  %v870_v48 = vadd.f32 -0.5, %v386_v23  ;;  %v871_v49 = vadd.f32 -0.5, %v387_v24  ;;  %v427_v51 = vld [vmem:[%s1059_s9 + $0x30] sm:$0xff]  ;;  %v428_v52 = vld [vmem:[%s1059_s9 + $0x38] sm:$0xff] }
  0x1a   : > { %v429_v53 = vsub.f32 %v413_v30, %v421_v37  ;;  %v1115_v54 = vld [vmem:[%s1109_s16 + $0x20] sm:$0xff]  ;;  %v430_v57 = vsub.f32 %v414_v35, %v422_v38  ;;  %v431_v58 = vsub.f32 %v1094_v36, %v423_v39  ;;  %v432_v59 = vsub.f32 %v1100_v44, %v424_v45  ;;  %v1130_v62 = vld [vmem:[%s1070_s13 + $0x28] sm:$0xff]  ;;  %v1133_v63 = vld [vmem:[%s1070_s13 + $0x30] sm:$0xff] }
  0x1b   : > { %v404_v55 = vsel %vm1075_vm0, %v396_v34, %v868_v43  ;;  %v1120_v56 = vld [vmem:[%s1070_s13 + $0x20] sm:$0xff]  ;;  %vm368_vm4 = vcmp.gt.f32.partialorder %v1115_v54, 0.0  ;;  %v405_v60 = vsel %vm1080_vm1, %v397_v40, %v869_v47  ;;  %v406_v61 = vsel %vm1084_vm2, %v398_v41, %v870_v48  ;;  %v1136_v2 = vld [vmem:[%s1070_s13 + $0x38] sm:$0xff] }
  0x1c   : > { %v433_v3 = vsub.f32 %v1120_v56, %v425_v46  ;;  %v408_v5 = vadd.f32 %v405_v60, %v404_v55  ;;  %v434_v7 = vsub.f32 %v1130_v62, %v426_v50  ;;  %v435_v8 = vsub.f32 %v1133_v63, %v427_v51 }
  0x1d   : > { %v1142_v9 = vsub.f32 %v1136_v2, %v428_v52  ;;  %v407_v10 = vsel %vm1088_vm3, %v399_v42, %v871_v49  ;;  %v437_v11 = vand.u32 2147483647, %v429_v53  ;;  %v438_v12 = vand.u32 2147483647, %v430_v57 }
  0x1e   : > { %v439_v13 = vand.u32 2147483647, %v431_v58  ;;  %v975_v14 = vmov 0.0   ;;  %v409_v18 = vadd.f32 %v408_v5, %v406_v61  ;;  %v440_v19 = vand.u32 2147483647, %v432_v59 }
  0x1f   : > { %v1149_v15 = vsel %vm368_vm4, 1.0, %v975_v14  ;;  %v507_v22 = vmul.f32 0.2, %v1044_v6  ;;  %v441_v23 = vand.u32 2147483647, %v433_v3  ;;  %v525_v27 = vmul.f32 %v1054_v17, %v414_v35 }
  0x20   : > { %v442_v24 = vand.u32 2147483647, %v434_v7  ;;  %v410_v28 = vadd.f32 %v409_v18, %v407_v10  ;;  %v443_v29 = vand.u32 2147483647, %v435_v8  ;;  %v444_v31 = vand.u32 2147483647, %v1142_v9 }
  0x21   : > { %vm1155_vm5 = vcmp.lt.f32.partialorder %v437_v11, 1.0  ;;  %vm1164_vm6 = vcmp.lt.f32.partialorder %v438_v12, 1.0  ;;  %vm1168_vm7 = vcmp.lt.f32.partialorder %v439_v13, 1.0  ;;  %vm1172_vm8 = vcmp.lt.f32.partialorder %v440_v19, 1.0 }
  0x22   : > { %v453_v34 = vmul.f32 0.5, %v429_v53  ;;  %v411_v35 = vmul.f32 %v1149_v15, %v410_v28  ;;  %v454_v37 = vmul.f32 0.5, %v430_v57  ;;  %v455_v38 = vmul.f32 0.5, %v431_v58 }
  0x23   : > { %v456_v39 = vmul.f32 0.5, %v432_v59  ;;  %v457_v40 = vmul.f32 0.5, %v433_v3  ;;  %v458_v41 = vmul.f32 0.5, %v434_v7  ;;  %v459_v42 = vmul.f32 0.5, %v435_v8 }
  0x24   : > { %v460_v43 = vmul.f32 0.5, %v1142_v9  ;;  %412 = vst [vmem:[%s1162_s23] sm:$0xff] %v411_v35  ;;  %vm1179_vm9 = vcmp.lt.f32.partialorder %v441_v23, 1.0  ;;  %vm1183_vm10 = vcmp.lt.f32.partialorder %v442_v24, 1.0  ;;  %v461_v47 = vmul.f32 %v453_v34, %v429_v53 }
  0x25   : > { %v462_v48 = vmul.f32 %v454_v37, %v430_v57  ;;  %v463_v49 = vmul.f32 %v455_v38, %v431_v58  ;;  %v464_v50 = vmul.f32 %v456_v39, %v432_v59  ;;  %v465_v51 = vmul.f32 %v457_v40, %v433_v3  ;;  %v495_v3 = vld [vmem:[%s1334_s4] sm:$0xff]  ;;  %v1224_v37 = vld [vmem:[%s1109_s16 + $0x8] sm:$0xff] }
  0x26   : > { %v466_v52 = vmul.f32 %v458_v41, %v434_v7  ;;  %vm1187_vm11 = vcmp.lt.f32.partialorder %v443_v29, 1.0  ;;  %v872_v60 = vadd.f32 -0.5, %v437_v11  ;;  %v873_v61 = vadd.f32 -0.5, %v438_v12 }
  0x27   : > { %v874_v5 = vadd.f32 -0.5, %v439_v13  ;;  %v875_v10 = vadd.f32 -0.5, %v440_v19  ;;  %v467_v14 = vmul.f32 %v459_v42, %v435_v8  ;;  %v1192_v18 = vmul.f32 %v460_v43, %v1142_v9 }
  0x28   : > { %v876_v28 = vadd.f32 -0.5, %v441_v23  ;;  %v877_v35 = vadd.f32 -0.5, %v442_v24  ;;  %v878_v53 = vadd.f32 -0.5, %v443_v29  ;;  %v879_v57 = vadd.f32 -0.5, %v444_v31 }
  0x29   : > { %v477_v58 = vsel %vm1155_vm5, %v461_v47, %v872_v60  ;;  %v478_v59 = vsel %vm1164_vm6, %v462_v48, %v873_v61  ;;  %v479_v7 = vsel %vm1168_vm7, %v463_v49, %v874_v5  ;;  %v480_v8 = vsel %vm1172_vm8, %v464_v50, %v875_v10 }
  0x2a   : > { %v481_v11 = vsel %vm1179_vm9, %v465_v51, %v876_v28  ;;  %v482_v12 = vsel %vm1183_vm10, %v466_v52, %v877_v35  ;;  %v485_v13 = vadd.f32 %v478_v59, %v477_v58  ;;  %v508_v19 = vmul.f32 1.442695, %v1065_v21 }
  0x2b   : > { %v510_v23 = vmul.f32 1.442695, %v507_v22  ;;  %v526_v24 = vmul.f32 %v1054_v17, %v1094_v36  ;;  %v527_v29 = vmul.f32 %v1054_v17, %v1100_v44  ;;  %v528_v32 = vadd.f32 %v524_v26, %v495_v3  ;;  %v1221_v22 = vld [vmem:[%s1109_s16] sm:$0xff]  ;;  %v1231_v26 = vld [vmem:[%s1109_s16 + $0x10] sm:$0xff] }
  0x2c   : > { %v529_v6 = vadd.f32 %v525_v27, %v495_v3  ;;  %v537_v30 = vmul.f32 %v1037_v1, %v1120_v56  ;;  %v486_v33 = vadd.f32 %v485_v13, %v479_v7  ;;  %923 = vpow2.f32 %v508_v19  ;;  %v1234_v56 = vld [vmem:[%s1109_s16 + $0x18] sm:$0xff] }
  0x2d   : > { %v530_v34 = vadd.f32 %v526_v24, %v495_v3  ;;  %v538_v21 = vmul.f32 %v1037_v1, %v1130_v62  ;;  %925 = vpow2.f32 %v510_v23  ;;  %v531_v36 = vadd.f32 %v527_v29, %v495_v3 }
  0x2e   : > { %v539_v17 = vmul.f32 %v1037_v1, %v1133_v63  ;;  %v540_v44 = vmul.f32 %v1037_v1, %v1136_v2  ;;  %v487_v27 = vadd.f32 %v486_v33, %v480_v8  ;;  %v541_v38 = vadd.f32 %v537_v30, %v1051_v16 }
  0x2f   : > { %v542_v62 = vadd.f32 %v538_v21, %v1051_v16  ;;  %v1238_v39 = vmax.f32 %v529_v6, %v530_v34  ;;  %v1242_v42 = vmin.f32 %v528_v32, %v531_v36  ;;  %v658_v1 = vmax.f32 %v1221_v22, %v1224_v37 }
  0x30   : > { %v543_v40 = vadd.f32 %v539_v17, %v1051_v16  ;;  %v544_v41 = vadd.f32 %v540_v44, %v1051_v16  ;;  %vm1248_vm12 = vcmp.lt.f32.partialorder %v444_v31, 1.0  ;;  %v488_v2 = vadd.f32 %v487_v27, %v481_v11 }
  0x31   : > { %v1252_v43 = vmin.f32 %v541_v38, %v542_v62  ;;  %v659_v45 = vmax.f32 %v1231_v26, %v1234_v56  ;;  %v483_v16 = vsel %vm1187_vm11, %v467_v14, %v878_v53  ;;  %v553_v47 = vadd.f32 %v1238_v39, %v1242_v42 }
  0x32   : > { %v1258_v46 = vmax.f32 %v543_v40, %v544_v41  ;;  %v489_v48 = vadd.f32 %v488_v2, %v482_v12  ;;  %v504_v9 = vadd.f32 %v1073_v25, %v495_v3  ;;  %v484_v49 = vsel %vm1248_vm12, %v1192_v18, %v879_v57 }
  0x33   : > { %v1263_v31 = vmax.f32 %v658_v1, %v659_v45  ;;  %v554_v51 = vmul.f32 0.5, %v553_v47  ;;  %v549_v60 = vsub.f32 %v1238_v39, %v1242_v42  ;;  %vm679_vm14 = vcmp.eq.f32.partialorder %v1115_v54, 0.0 }
  0x34   : > { %v1270_v50 = vsub.f32 %v1258_v46, %v1252_v43  ;;  %v555_v52 = vadd.f32 %v1258_v46, %v1252_v43  ;;  %v490_v55 = vadd.f32 %v489_v48, %v483_v16  ;;  %vm682_vm15 = vcmp.eq.f32.partialorder %v1115_v54, 1.0 }
  0x35   : > { %v661_v25 = vsub.f32 %v1221_v22, %v1263_v31  ;;  %v662_v61 = vsub.f32 %v1224_v37, %v1263_v31  ;;  %v577_v10 = vsub.f32 %v504_v9, %v554_v51  ;;  %v663_v18 = vsub.f32 %v1231_v26, %v1263_v31 }
  0x36   : > { %v556_v5 = vmul.f32 0.5, %v555_v52  ;;  %v590_v14 = vand.u32 2147483647, %v1270_v50  ;;  %v924_v28 = vpop.eup %923  ;;  %v491_v35 = vadd.f32 %v490_v55, %v484_v49  ;;  %v551_v53 = vmul.f32 %v1270_v50, %v549_v60 }
  0x37   : > { %v664_v57 = vsub.f32 %v1234_v56, %v1263_v31  ;;  %v665_v58 = vmul.f32 1.442695, %v661_v25  ;;  %v926_v59 = vpop.eup %925  ;;  %v512_v3 = vmul.f32 %v924_v28, %v1042_v4  ;;  %v578_v7 = vmul.f32 %v577_v10, %v577_v10 }
  0x38   : > { %v579_v8 = vsub.f32 %v1063_v20, %v556_v5  ;;  %v591_v11 = vmax.f32 %v590_v14, 1e-09  ;;  %v492_v12 = vmul.f32 %v1149_v15, %v491_v35  ;;  %v513_v13 = vmul.f32 %v926_v59, %v1030_v0 }
  0x39   : > { %927 = vpow2.f32 %v665_v58  ;;  %v667_v19 = vmul.f32 1.442695, %v662_v61  ;;  %v514_v23 = vmul.f32 0.5, %v512_v3  ;;  %v669_v29 = vmul.f32 1.442695, %v663_v18 }
  0x3a   : > { %v580_v24 = vmul.f32 %v579_v8, %v579_v8  ;;  %929 = vrcp.f32 %v591_v11  ;;  %880 = vst [vmem:[%s1162_s23 + $0x8] sm:$0xff] %v492_v12  ;;  %v515_v32 = vmul.f32 0.5, %v513_v13  ;;  %v552_v6 = vmul.f32 %v513_v13, %v512_v3 }
  0x3b   : > { %v598_v30 = vmax.f32 %v513_v13, 1e-09  ;;  %931 = vpow2.f32 %v667_v19  ;;  %v516_v4 = vsub.f32 %v504_v9, %v514_v23  ;;  %v671_v34 = vmul.f32 1.442695, %v664_v57 }
  0x3c   : > { %v1291_v33 = vadd.f32 %v580_v24, %v578_v7  ;;  %933 = vpow2.f32 %v669_v29  ;;  %v517_v15 = vsub.f32 %v1063_v20, %v515_v32  ;;  %v582_v21 = vadd.f32 %v552_v6, %v551_v53 }
  0x3d   : > { %935 = vrcp.f32 %v598_v30  ;;  %v518_v0 = vadd.f32 %v516_v4, %v512_v3  ;;  %v558_v36 = vmax.f32 %v1242_v42, %v516_v4  ;;  %v567_v17 = vmin.f32 %v1242_v42, %v516_v4 }
  0x3e   : > { %937 = vpow2.f32 %v671_v34  ;;  %v519_v44 = vadd.f32 %v517_v15, %v513_v13  ;;  %v562_v27 = vmax.f32 %v1252_v43, %v517_v15  ;;  %v571_v38 = vmin.f32 %v1252_v43, %v517_v15 }
  0x3f   : > { %v557_v62 = vmin.f32 %v1238_v39, %v518_v0  ;;  %v566_v40 = vmax.f32 %v1238_v39, %v518_v0  ;;  %v594_v1 = vsub.f32 0.0, %v549_v60  ;;  %vm593_vm13 = vcmp.lt.f32.partialorder %v1270_v50, 0.0 }
  0x40   : > { %v561_v41 = vmin.f32 %v1258_v46, %v519_v44  ;;  %v570_v20 = vmax.f32 %v1258_v46, %v519_v44  ;;  %v680_v8 = vsel %vm679_vm14, %v1221_v22, 0.0  ;;  %v683_v11 = vsel %vm682_vm15, %v1224_v37, 0.0 }
  0x41   : > { %v559_v63 = vsub.f32 %v557_v62, %v558_v36  ;;  %v568_v2 = vsub.f32 %v566_v40, %v567_v17  ;;  %vm685_vm0 = vcmp.eq.f32.partialorder %v1115_v54, 2.0  ;;  %v684_v12 = vadd.f32 %v683_v11, %v680_v8 }
  0x42   : > { %v563_v16 = vsub.f32 %v561_v41, %v562_v27  ;;  %v572_v42 = vsub.f32 %v570_v20, %v571_v38  ;;  %v686_v19 = vsel %vm685_vm0, %v1231_v26, 0.0  ;;  %vm688_vm1 = vcmp.eq.f32.partialorder %v1115_v54, 3.0 }
  0x43   : > { %v928_v45 = vpop.eup %927  ;;  %v560_v48 = vmax.f32 %v559_v63, 0.0  ;;  %v569_v9 = vmax.f32 %v568_v2, 0.0  ;;  %v687_v23 = vadd.f32 %v686_v19, %v684_v12  ;;  %v689_v24 = vsel %vm688_vm1, %v1234_v56, 0.0 }
  0x44   : > { %v930_v47 = vpop.eup %929  ;;  %v564_v49 = vmax.f32 %v563_v16, 0.0  ;;  %v573_v51 = vmax.f32 %v572_v42, 0.0 }
  0x45   : > { %v932_v43 = vpop.eup %931  ;;  %v595_v52 = vmul.f32 %v930_v47, %v594_v1  ;;  %v596_v39 = vmul.f32 %v930_v47, %v549_v60  ;;  %v574_v25 = vmul.f32 %v569_v9, %v569_v9  ;;  %v690_v6 = vadd.f32 %v689_v24, %v687_v23 }
  0x46   : > { %v934_v55 = vpop.eup %933  ;;  %v673_v61 = vadd.f32 %v932_v43, %v928_v45  ;;  %v565_v5 = vmul.f32 %v564_v49, %v560_v48  ;;  %v575_v10 = vmul.f32 %v573_v51, %v573_v51  ;;  %v976_v9 = vmov -3.1415927  }
  0x47   : > { %v936_v46 = vpop.eup %935  ;;  %v597_v14 = vsel %vm593_vm13, %v595_v52, %v596_v39 }
  0x48   : > { %v938_v18 = vpop.eup %937  ;;  %v600_v28 = vmul.f32 %v936_v46, %v512_v3  ;;  %v674_v35 = vadd.f32 %v934_v55, %v673_v61  ;;  %v576_v53 = vadd.f32 %v575_v10, %v574_v25  ;;  %v583_v57 = vsub.f32 %v582_v21, %v565_v5 }
  0x4a   : > { %v602_v50 = vmul.f32 %v600_v28, %v597_v14  ;;  %v675_v58 = vadd.f32 %v938_v18, %v674_v35  ;;  %v584_v59 = vmax.f32 %v583_v57, 1e-09  ;;  %v587_v60 = vmax.f32 %v576_v53, 1e-09 }
  0x4b   : > { %v601_v29 = vsub.f32 %v600_v28, %v597_v14 }
  0x4c   : > { %v603_v7 = vadd.f32 1.0, %v602_v50  ;;  %939 = vlog2.f32 %v675_v58 }
  0x4d   : > { %941 = vrcp.f32 %v584_v59  ;;  %v608_v15 = vsub.f32 0.0, %v601_v29  ;;  %vm634_vm5 = vcmp.ge.f32.partialorder %v601_v29, 0.0 }
  0x4e   : > { %943 = vrcp.f32 %v587_v60  ;;  %v604_v3 = vand.u32 2147483647, %v603_v7  ;;  %vm607_vm2 = vcmp.lt.f32.partialorder %v603_v7, 0.0  ;;  %v635_v43 = vsel %vm634_vm5, 3.1415927, %v976_v9 }
  0x4f   : > { %v636_v52 = vsel %vm607_vm2, %v635_v43, 0.0 }
  0x50   : > { %v605_v13 = vmax.f32 %v604_v3, 1e-09 }
  0x52   : > { %945 = vrcp.f32 %v605_v13 }
  0x56   : > { %v940_v22 = vpop.eup %939 }
  0x57   : > { %v942_v32 = vpop.eup %941  ;;  %v677_v37 = vmul.f32 0.6931472, %v940_v22 }
  0x58   : > { %v944_v30 = vpop.eup %943  ;;  %v586_v4 = vmul.f32 %v942_v32, %v565_v5 }
  0x59   : > { %v589_v34 = vmul.f32 %v944_v30, %v1291_v33  ;;  %v678_v21 = vadd.f32 %v677_v37, %v1263_v31 }
  0x5a   : > { %v640_v61 = vsub.f32 1.0, %v586_v4 }
  0x5b   : > { %v691_v26 = vsub.f32 %v678_v21, %v690_v6 }
  0x5c   : > { %v946_v0 = vpop.eup %945 }
  0x5d   : > { %v609_v36 = vmul.f32 %v946_v0, %v608_v15  ;;  %v610_v17 = vmul.f32 %v946_v0, %v601_v29  ;;  %889 = vst [vmem:[%s1162_s23 + $0x18] sm:$0xff] %v691_v26 }
  0x5f   : > { %v611_v56 = vsel %vm607_vm2, %v609_v36, %v610_v17 }
  0x60   : > { %v612_v44 = vand.u32 2147483647, %v611_v56  ;;  %vm631_vm6 = vcmp.lt.f32.partialorder %v611_v56, 0.0 }
  0x62   : > { %v614_v27 = vmax.f32 %v612_v44, 1e-20  ;;  %vm613_vm3 = vcmp.gt.f32.partialorder %v612_v44, 1.0 }
  0x64   : > { %947 = vrcp.f32 %v614_v27 }
  0x6e   : > { %v948_v38 = vpop.eup %947 }
  0x6f   : > { %v616_v62 = vsel %vm613_vm3, %v948_v38, %v612_v44 }
  0x70   : > { %v617_v40 = vmul.f32 %v616_v62, %v616_v62 }
  0x72   : > { %v618_v33 = vmul.f32 -0.0117212, %v617_v40 }
  0x74   : > { %v619_v41 = vadd.f32 0.05265332, %v618_v33 }
  0x76   : > { %v620_v20 = vmul.f32 %v619_v41, %v617_v40 }
  0x78   : > { %v621_v31 = vadd.f32 -0.11643287, %v620_v20 }
  0x7a   : > { %v622_v1 = vmul.f32 %v621_v31, %v617_v40 }
  0x7c   : > { %v623_v63 = vadd.f32 0.19354346, %v622_v1 }
  0x7e   : > { %v624_v2 = vmul.f32 %v623_v63, %v617_v40 }
  0x80   : > { %v625_v45 = vadd.f32 -0.33262348, %v624_v2 }
  0x82   : > { %v626_v16 = vmul.f32 %v625_v45, %v617_v40 }
  0x84   : > { %v627_v42 = vadd.f32 0.99997723, %v626_v16 }
  0x86   : > { %v628_v47 = vmul.f32 %v627_v42, %v616_v62 }
  0x88   : > { %v629_v48 = vsub.f32 1.5707964, %v628_v47 }
  0x8a   : > { %v630_v49 = vsel %vm613_vm3, %v629_v48, %v628_v47 }
  0x8b   : > { %v632_v51 = vsub.f32 0.0, %v630_v49 }
  0x8d   : > { %v633_v39 = vsel %vm631_vm6, %v632_v51, %v630_v49 }
  0x8e   : > { %v637_v55 = vadd.f32 %v636_v52, %v633_v39 }
  0x90   : > { %v638_v25 = vmul.f32 0.40528473, %v637_v55 }
  0x92   : > { %v639_v46 = vmul.f32 %v638_v25, %v637_v55 }
  0x94   : > { %v641_v5 = vadd.f32 %v640_v61, %v639_v46 }
  0x96   : > { %v642_v10 = vadd.f32 1e-09, %v641_v5 }
  0x98   : > { %949 = vrcp.f32 %v642_v10 }
  0xa2   : > { %v950_v14 = vpop.eup %949 }
  0xa3   : > { %v644_v18 = vmul.f32 %v950_v14, %v639_v46 }
  0xa5   : > { %v645_v28 = vmul.f32 %v644_v18, %v639_v46 }
  0xa7   : > { %v646_v35 = vadd.f32 %v645_v28, %v589_v34 }
  0xa9   : > { %v647_v53 = vsub.f32 %v586_v4, %v646_v35 }
  0xab   : > { %v887_v57 = vclamps-f32 %v647_v53, 1.0 }
  0xad   : > { %v650_v50 = vsub.f32 1.0, %v887_v57 }
  0xaf   : > { %v651_v58 = vsel %vm368_vm4, %v650_v50, 0.0 }
  0xb0   : > { %888 = vst [vmem:[%s1162_s23 + $0x10] sm:$0xff] %v651_v58 }
  0xb1 PF: > { %s15_s20 = sadd.s32 1, %s973_s20   ;;  %s1360_s18 = smov %s969_s19 }
  0xb2   : > { %p12_p5 = scmp.ge.s32.totalorder %s15_s20, 4   ;;  %s1361_s19 = smov %s1363_s21 }
  0xb4   :  { %14 = sbr.rel (!%p12_p5) target bundleno = 2 (0x2), region = 89 }

</bundles_post_ra>
